<compile_context>
chip_gen: v7x
topology: tpu7x:2x2x1
jax: 0.10.0
libtpu: 0.0.40
codegen_flags: <defaults>
</compile_context>

<pallas_src>
import functools

import jax
import jax.numpy as jnp
from jax import lax
from jax.experimental import pallas as pl
from jax.experimental.pallas import tpu as pltpu


def _round_up(x, m):
    return ((x + m - 1) // m) * m


def _vmem_budget_and_limit():
    """Per-step working-set budget and scoped-VMEM limit, per TPU generation."""
    try:
        cap = pltpu.get_tpu_info().vmem_capacity_bytes
    except Exception:
        cap = 64 * 1024 * 1024                       # assume the smallest (v7x per-TC)
    if cap >= 128 * 1024 * 1024:                     # v5e / v6e: lots of headroom
        return 48 * 1024 * 1024, 64 * 1024 * 1024
    return 24 * 1024 * 1024, 32 * 1024 * 1024        # v7x: 64 MiB per TC


def transe_kernel(e1_ref, r_ref, e2_ref, out_ref, *, p, transe_sp):
    """Per-tile TransE scoring: elementwise combine + feature-axis reduction."""
    x = (e1_ref[...].astype(jnp.float32)
         + r_ref[...].astype(jnp.float32)
         - e2_ref[...].astype(jnp.float32))                       # (TM, D) f32

    if transe_sp:
        # -F.normalize(x, p=2, dim=1).sum(dim=1) == -sum(x) * rsqrt(sum(x^2))
        s = jnp.sum(x, axis=1)                                    # (TM,)
        nrm_sq = jnp.sum(x * x, axis=1)                           # (TM,)
        pred = -(s * lax.rsqrt(nrm_sq))
    else:
        if p == 1:
            pred = -jnp.sum(jnp.abs(x), axis=1)
        elif p == 2:
            pred = -jnp.sqrt(jnp.sum(x * x, axis=1))
        else:
            # Avoid per-element exp+log on the single EUP (matters on v5e):
            # special-case small integer p via repeated VPU multiplies.
            ip = int(p)
            if float(p) == float(ip) and 1 <= ip <= 4:
                ax = jnp.abs(x)
                t = ax
                for _ in range(ip - 1):
                    t = t * ax
                s = jnp.sum(t, axis=1)
            else:
                s = jnp.sum(jnp.power(jnp.abs(x), p), axis=1)
            pred = -jnp.power(s, 1.0 / p)                         # per-row only

    # Lane-dense store: (TM,) -> (1, 1, TM) block of the output slab.
    out_ref[...] = pred.reshape(out_ref.shape).astype(out_ref.dtype)


def transe_forward(e1, r, e2, *, p=2.0, transe_sp=False, block_rows=None):
    """Pallas TransE forward.  e1, r, e2: (B, D).  Returns (B,) f32 scores."""
    B, D = e1.shape
    assert r.shape == (B, D) and e2.shape == (B, D)

    d_pad = _round_up(D, 128)                       # lane-padded VMEM width
    itemsize = jnp.dtype(e1.dtype).itemsize
    # Min sublane granularity of the input tile: 8 for f32, 16 for bf16, 32 for 8-bit.
    sub = max(8, 32 // itemsize)

    budget_bytes, vmem_limit = _vmem_budget_and_limit()

    if block_rows is None:
        # Real per-row VMEM footprint: 3 inputs x 2 pipeline buffers (input
        # dtype, lane-padded) + ~3 f32 temporaries for the compute copy.
        bytes_per_row = 2 * 3 * d_pad * itemsize + 3 * d_pad * 4
        tm = budget_bytes // bytes_per_row
        tm = max(128, (tm // 128) * 128)            # 128-lane-aligned output blocks
        # Keep at least 2 grid steps when B allows it, so both v7x TCs get work.
        tm = min(tm, max(128, _round_up(pl.cdiv(B, 2), 128)))
    else:
        assert block_rows % sub == 0, (block_rows, sub)
        tm = block_rows
    # Never use a block (much) taller than the batch itself.
    tm = min(tm, _round_up(B, sub))

    num_tiles = pl.cdiv(B, tm)
    b_pad = num_tiles * tm
    # NOTE: no jnp.pad here.  If tm does not divide B, the last input block is
    # a partial block (out-of-range rows read garbage); those rows land in the
    # tail of the output slab and are sliced off below.  Under transe_sp they
    # may be NaN/inf -- harmless, they never reach the returned array.

    kernel = functools.partial(transe_kernel, p=p, transe_sp=transe_sp)
    out = pl.pallas_call(
        kernel,
        out_shape=jax.ShapeDtypeStruct((num_tiles, 1, tm), jnp.float32),
        grid=(num_tiles,),
        in_specs=[
            pl.BlockSpec((tm, D), lambda i: (i, 0)),   # e1
            pl.BlockSpec((tm, D), lambda i: (i, 0)),   # r
            pl.BlockSpec((tm, D), lambda i: (i, 0)),   # e2
        ],
        out_specs=pl.BlockSpec((1, 1, tm), lambda i: (i, 0, 0)),
        compiler_params=pltpu.CompilerParams(
            dimension_semantics=("parallel",),         # shard grid over v7x's 2 TCs
            vmem_limit_bytes=vmem_limit),
    )(e1, r, e2)

    return out.reshape(b_pad)[:B]


def transe_reference(e1, r, e2, *, p=2.0, transe_sp=False):
    """Pure-JAX reference for verification (f32 math)."""
    x = (e1.astype(jnp.float32) + r.astype(jnp.float32)
         - e2.astype(jnp.float32))
    if transe_sp:
        n = x / jnp.linalg.norm(x, axis=1, keepdims=True)
        return -jnp.sum(n, axis=1)
    if p == 1:
        return -jnp.sum(jnp.abs(x), axis=1)
    if p == 2:
        return -jnp.sqrt(jnp.sum(x * x, axis=1))
    return -jnp.power(jnp.sum(jnp.power(jnp.abs(x), p), axis=1), 1.0 / p)


if __name__ == "__main__":
    B, D = 40, 32                  # small demo shapes

    key = jax.random.PRNGKey(0)
    k1, k2, k3 = jax.random.split(key, 3)
    e1 = jax.random.normal(k1, (B, D), dtype=jnp.float32)
    r = jax.random.normal(k2, (B, D), dtype=jnp.float32)
    e2 = jax.random.normal(k3, (B, D), dtype=jnp.float32)

    configs = [
        # (p, transe_sp, block_rows, dtype)
        (2.0, False, None, jnp.float32),    # auto tile size, single full tile
        (2.0, False, 16,   jnp.float32),    # multi-tile + partial last block
        (1.0, False, 16,   jnp.float32),    # L1 norm
        (3.0, False, 16,   jnp.float32),    # integer-p fast path (no exp/log)
        (2.0, True,  16,   jnp.float32),    # -normalize(e1 + r - e2).sum(dim=1)
        (2.0, False, 16,   jnp.bfloat16),   # halved HBM traffic, f32 compute
    ]

    for p, sp, br, dt in configs:
        a, b, c = e1.astype(dt), r.astype(dt), e2.astype(dt)
        score = transe_forward(a, b, c, p=p, transe_sp=sp, block_rows=br)
        jax.block_until_ready(score)
        ref = transe_reference(a, b, c, p=p, transe_sp=sp)
        assert score.shape == (B,), (score.shape, p, sp, br, dt)
        assert jnp.allclose(score, ref, atol=1e-4, rtol=1e-4), (p, sp, br, dt)

    print("KERNEL_OK")
</pallas_src>

<mosaic_0001>
module attributes {stable_mosaic.version = 11 : i64} {
  func.func @transe_kernel(%arg0: i32, %arg1: memref<40x32xf32, #tpu.memory_space<vmem>>, %arg2: memref<40x32xf32, #tpu.memory_space<vmem>>, %arg3: memref<40x32xf32, #tpu.memory_space<vmem>>, %arg4: memref<1x1x40xf32, #tpu.memory_space<vmem>>) attributes {dimension_semantics = [#tpu.dimension_semantics<parallel>], iteration_bounds = array<i64: 1>, scalar_prefetch = 0 : i64, scratch_operands = 0 : i64, tpu.core_type = #tpu.core_type<tc>, window_params = [{transform_indices = @transform_0, window_bounds = array<i64: 40, 32>}, {transform_indices = @transform_1, window_bounds = array<i64: 40, 32>}, {transform_indices = @transform_2, window_bounds = array<i64: 40, 32>}, {transform_indices = @transform_3, window_bounds = array<i64: 1, 1, 40>}]} {
    %c0 = arith.constant 0 : index
    %c0_0 = arith.constant 0 : index
    %0 = vector.load %arg1[%c0, %c0_0] : memref<40x32xf32, #tpu.memory_space<vmem>>, vector<40x32xf32>
    %c0_1 = arith.constant 0 : index
    %c0_2 = arith.constant 0 : index
    %1 = vector.load %arg2[%c0_1, %c0_2] : memref<40x32xf32, #tpu.memory_space<vmem>>, vector<40x32xf32>
    %2 = arith.addf %0, %1 : vector<40x32xf32>
    %c0_3 = arith.constant 0 : index
    %c0_4 = arith.constant 0 : index
    %3 = vector.load %arg3[%c0_3, %c0_4] : memref<40x32xf32, #tpu.memory_space<vmem>>, vector<40x32xf32>
    %4 = arith.subf %2, %3 : vector<40x32xf32>
    %5 = arith.mulf %4, %4 : vector<40x32xf32>
    %cst = arith.constant dense<0.000000e+00> : vector<40xf32>
    %6 = vector.multi_reduction <add>, %5, %cst [1] : vector<40x32xf32> to vector<40xf32>
    %7 = math.sqrt %6 : vector<40xf32>
    %cst_5 = arith.constant 0.000000e+00 : f32
    %8 = vector.broadcast %cst_5 : f32 to vector<40xf32>
    %9 = arith.subf %8, %7 : vector<40xf32>
    %10 = vector.shape_cast %9 : vector<40xf32> to vector<1x1x40xf32>
    %c0_6 = arith.constant 0 : index
    %c0_7 = arith.constant 0 : index
    %c0_8 = arith.constant 0 : index
    %11 = vector.load %arg4[%c0_6, %c0_7, %c0_8] : memref<1x1x40xf32, #tpu.memory_space<vmem>>, vector<1x1x40xf32>
    tpu.vector_store %arg4[%c0_6, %c0_7, %c0_8], %10 {strides = array<i32>} : memref<1x1x40xf32, #tpu.memory_space<vmem>>, vector<1x1x40xf32>,
    return
  }
  func.func @transform_0(%arg0: i32) -> (i32, i32) {
    %c0_i32 = arith.constant 0 : i32
    %c0_i32_0 = arith.constant 0 : i32
    return %arg0, %c0_i32 : i32, i32
  }
  func.func @transform_1(%arg0: i32) -> (i32, i32) {
    %c0_i32 = arith.constant 0 : i32
    %c0_i32_0 = arith.constant 0 : i32
    return %arg0, %c0_i32 : i32, i32
  }
  func.func @transform_2(%arg0: i32) -> (i32, i32) {
    %c0_i32 = arith.constant 0 : i32
    %c0_i32_0 = arith.constant 0 : i32
    return %arg0, %c0_i32 : i32, i32
  }
  func.func @transform_3(%arg0: i32) -> (i32, i32, i32) {
    %c0_i32 = arith.constant 0 : i32
    %c0_i32_0 = arith.constant 0 : i32
    %c0_i32_1 = arith.constant 0 : i32
    return %arg0, %c0_i32, %c0_i32_0 : i32, i32, i32
  }
}

</mosaic_0001>

<bundles_post_ra>
// kernel: tpu_custom_call.1
= control target key start
LH: loop header
LB: loop body
LE: loop exit
PB: predicated region body
PF: predicated region fallthrough
CT: control target
= control target key end

     0   :  { %vm45_vm0 = vcmask 261120   ;;  %s282_s0 = inlined_call_operand.vmem [shape: f32[40,32], index: 0, kind: input, shape index: {}]   ;;  %s283_s1 = inlined_call_operand.vmem [shape: f32[40,32], index: 1, kind: input, shape index: {}]   ;;  %s284_s2 = inlined_call_operand.vmem [shape: f32[40,32], index: 2, kind: input, shape index: {}]   ;;  %s285_s3 = inlined_call_operand.hbm [shape: f32[1,1,40], index: 3, kind: output, shape index: {}]  }
   0x1   :  { %v17_v0 = vld [vmem:[%s282_s0 + $0x10] sm:$0xff]  ;;  %v15_v4 = vld [vmem:[%s282_s0] sm:$0xff]  ;;  %v18_v8 = vld [vmem:[%s282_s0 + $0x18] sm:$0xff] }
   0x2   :  { %v22_v1 = vld [vmem:[%s283_s1 + $0x10] sm:$0xff]  ;;  %v20_v5 = vld [vmem:[%s283_s1] sm:$0xff]  ;;  %v23_v9 = vld [vmem:[%s283_s1 + $0x18] sm:$0xff] }
   0x3   :  { %v32_v2 = vld [vmem:[%s284_s2 + $0x10] sm:$0xff]  ;;  %v27_v3 = vadd.f32 %v22_v1, %v17_v0  ;;  %v30_v6 = vld [vmem:[%s284_s2] sm:$0xff]  ;;  %v25_v7 = vadd.f32 %v20_v5, %v15_v4  ;;  %v33_v10 = vld [vmem:[%s284_s2 + $0x18] sm:$0xff]  ;;  %v28_v12 = vadd.f32 %v23_v9, %v18_v8 }
   0x4   :  { %v16_v13 = vld [vmem:[%s282_s0 + $0x8] sm:$0xff]  ;;  %v19_v18 = vld [vmem:[%s282_s0 + $0x20] sm:$0xff] }
   0x5   :  { %v37_v11 = vsub.f32 %v27_v3, %v32_v2  ;;  %v21_v14 = vld [vmem:[%s283_s1 + $0x8] sm:$0xff]  ;;  %v35_v16 = vsub.f32 %v25_v7, %v30_v6  ;;  %v24_v19 = vld [vmem:[%s283_s1 + $0x20] sm:$0xff]  ;;  %v38_v22 = vsub.f32 %v28_v12, %v33_v10 }
   0x6   :  { %v31_v15 = vld [vmem:[%s284_s2 + $0x8] sm:$0xff]  ;;  %v26_v17 = vadd.f32 %v21_v14, %v16_v13  ;;  %v34_v20 = vld [vmem:[%s284_s2 + $0x20] sm:$0xff]  ;;  %v29_v23 = vadd.f32 %v24_v19, %v19_v18 }
   0x7   :  { %v42_v21 = vmul.f32 %v37_v11, %v37_v11 }
   0x8   :  { %8 = vsyncpa [#allocation3], 0  ;;  %v40_v24 = vmul.f32 %v35_v16, %v35_v16  ;;  %v36_v25 = vsub.f32 %v26_v17, %v31_v15  ;;  %v43_v27 = vmul.f32 %v38_v22, %v38_v22  ;;  %v39_v28 = vsub.f32 %v29_v23, %v34_v20  ;;  %s192_s0 = smov [#allocation2]  }
   0x9   :  { %v52_v26 = vsel %vm45_vm0, %v42_v21, 0.0  ;;  %v106_v39 = vlaneseq  ;;  %vm117_vm9 = vcmask 130112   ;;  %vm124_vm11 = vcmask 195712   ;;  %s149_s1 = sshll.u32 %s192_s0, 4  ;;  %s150_s1 = int_to_ptr.vmem [resolvable:$true] %s149_s1 }
   0xa   :  { %53 = vadd.xlane.f32.xlu1 %v52_v26  ;;  %v46_v29 = vsel %vm45_vm0, %v40_v24, 0.0  ;;  %v41_v30 = vmul.f32 %v36_v25, %v36_v25  ;;  %v55_v31 = vsel %vm45_vm0, %v43_v27, 0.0  ;;  %v44_v33 = vmul.f32 %v39_v28, %v39_v28  ;;  %s168_s2 = scalar_lea.vmem %s150_s1, 16  ;;  %s172_s15 = scalar_lea.vmem %s150_s1, 32 }
   0xb   :  { %47 = vadd.xlane.f32.xlu0 %v46_v29  ;;  %v107_v41 = vand.u32 127, %v106_v39  ;;  %v263_v42 = vshrl.u32 %v106_v39, 7  ;;  %vm131_vm13 = vcmask 261312   ;;  %vm138_vm14 = vcmask 326912   ;;  %p169_p0 = scmp.ne.s32.totalorder %s150_s1, %s168_s2  ;;  %p173_p1 = scmp.lt.s32.totalorder %s150_s1, %s150_s1 }
   0xc   :  { %v49_v32 = vsel %vm45_vm0, %v41_v30, 0.0  ;;  %v58_v34 = vsel %vm45_vm0, %v44_v33, 0.0  ;;  %vm141_vm15 = vcmask 319488   ;;  %p174_p2 = scmp.lt.s32.totalorder %s172_s15, %s168_s2 }
   0xd   :  { %v112_v44 = vadd.s32 4294967288, %v107_v41  ;;  %v110_v48 = vsub.s32 %v107_v41, %v263_v42  ;;  %v119_v49 = vadd.s32 4294967280, %v107_v41  ;;  %v126_v52 = vadd.s32 4294967272, %v107_v41 }
   0xe   :  { %56 = vadd.xlane.f32.xlu1 %v55_v31  ;;  %v133_v60 = vadd.s32 4294967264, %v107_v41  ;;  %p175_p3 = por %p174_p2, %p173_p1 }
   0xf   :  { %50 = vadd.xlane.f32.xlu0 %v49_v32  ;;  %v115_v56 = vsub.s32 %v112_v44, %v263_v42  ;;  %v122_v8 = vsub.s32 %v119_v49, %v263_v42  ;;  %v129_v9 = vsub.s32 %v126_v52, %v263_v42 }
  0x10   :  { %v136_v14 = vsub.s32 %v133_v60, %v263_v42  ;;  %p176_p4 = pnand %p175_p3, %p169_p0 }
  0x13   :  { %59 = vadd.xlane.f32.xlu0 %v58_v34 }
  0x97   :  { %v54_v35 = vpop.xlane.xlu1 %53 }
  0x98   :  { %158 = vrsqrt.f32 %v54_v35  ;;  %v48_v36 = vpop.xlane.xlu0 %47  ;;  %vm77_vm1 = vcmp.eq.f32.partialorder %v54_v35, inf  ;;  %v80_v54 = vand.u32 2147483648, %v54_v35  ;;  %vm79_vm4 = vcmp.eq.f32.partialorder %v54_v35, 0.0 }
  0x99   :  { %160 = vrsqrt.f32 %v48_v36  ;;  %vm63_vm2 = vcmp.eq.f32.partialorder %v48_v36, inf  ;;  %v66_v51 = vand.u32 2147483648, %v48_v36  ;;  %vm65_vm3 = vcmp.eq.f32.partialorder %v48_v36, 0.0 }
  0x9b   :  { %v57_v37 = vpop.xlane.xlu1 %56 }
  0x9c   :  { %162 = vrsqrt.f32 %v57_v37  ;;  %v51_v38 = vpop.xlane.xlu0 %50  ;;  %vm84_vm5 = vcmp.eq.f32.partialorder %v57_v37, inf  ;;  %v87_v61 = vand.u32 2147483648, %v57_v37  ;;  %vm86_vm6 = vcmp.eq.f32.partialorder %v57_v37, 0.0 }
  0x9d   :  { %164 = vrsqrt.f32 %v51_v38  ;;  %vm70_vm7 = vcmp.eq.f32.partialorder %v51_v38, inf  ;;  %v73_v1 = vand.u32 2147483648, %v51_v38  ;;  %vm72_vm8 = vcmp.eq.f32.partialorder %v51_v38, 0.0 }
  0xa0   :  { %v60_v40 = vpop.xlane.xlu0 %59 }
  0xa1   :  { %166 = vrsqrt.f32 %v60_v40  ;;  %vm91_vm10 = vcmp.eq.f32.partialorder %v60_v40, inf  ;;  %v94_v13 = vand.u32 2147483648, %v60_v40  ;;  %vm93_vm12 = vcmp.eq.f32.partialorder %v60_v40, 0.0 }
  0xa2   :  { %v159_v43 = vpop.eup %158 }
  0xa3   :  { %v161_v45 = vpop.eup %160  ;;  %v76_v46 = vmul.f32 %v159_v43, %v54_v35 }
  0xa4   :  { %v62_v47 = vmul.f32 %v161_v45, %v48_v36 }
  0xa5   :  { %v78_v50 = vsel %vm77_vm1, %v54_v35, %v76_v46 }
  0xa6   :  { %v163_v53 = vpop.eup %162  ;;  %v64_v55 = vsel %vm63_vm2, %v48_v36, %v62_v47  ;;  %v81_v63 = vsel %vm79_vm4, %v80_v54, %v78_v50 }
  0xa7   :  { %v165_v57 = vpop.eup %164  ;;  %v67_v58 = vsel %vm65_vm3, %v66_v51, %v64_v55  ;;  %v83_v59 = vmul.f32 %v163_v53, %v57_v37  ;;  %v98_v7 = vsub.f32 0.0, %v81_v63 }
  0xa8   :  { %v69_v62 = vmul.f32 %v165_v57, %v51_v38  ;;  %v96_v2 = vsub.f32 0.0, %v67_v58 }
  0xa9   :  { %v85_v0 = vsel %vm84_vm5, %v57_v37, %v83_v59  ;;  %v123_v19 = vrot.slane %v98_v7, %v122_v8 }
  0xaa   :  { %v88_v3 = vsel %vm86_vm6, %v87_v61, %v85_v0  ;;  %v71_v4 = vsel %vm70_vm7, %v51_v38, %v69_v62  ;;  %v111_v16 = vrot.slane %v96_v2, %v110_v48 }
  0xab   :  { %v167_v5 = vpop.eup %166  ;;  %v74_v6 = vsel %vm72_vm8, %v73_v1, %v71_v4  ;;  %v99_v10 = vsub.f32 0.0, %v88_v3 }
  0xac   :  { %v97_v11 = vsub.f32 0.0, %v74_v6  ;;  %v90_v12 = vmul.f32 %v167_v5, %v60_v40 }
  0xad   :  { %v130_v22 = vrot.slane %v99_v10, %v129_v9 }
  0xae   :  { %v92_v15 = vsel %vm91_vm10, %v60_v40, %v90_v12  ;;  %v116_v17 = vrot.slane %v97_v11, %v115_v56 }
  0xaf   :  { %v95_v18 = vsel %vm93_vm12, %v94_v13, %v92_v15 }
  0xb0   :  { %v100_v20 = vsub.f32 0.0, %v95_v18  ;;  %v118_v21 = vsel %vm117_vm9, %v116_v17, %v111_v16 }
  0xb1   :  { %v125_v23 = vsel %vm124_vm11, %v123_v19, %v118_v21 }
  0xb2   :  { %v132_v24 = vsel %vm131_vm13, %v130_v22, %v125_v23  ;;  %v137_v25 = vrot.slane %v100_v20, %v136_v14 }
  0xb4   :  { %v139_v26 = vsel %vm138_vm14, %v137_v25, %v132_v24 }
  0xb5   :  { %142 = vst.msk [vmem:[#allocation2] sm:$0x1] %vm141_vm15, %v139_v26 }
  0xb6   :  { %179 = shalt.err (!%p176_p4)
}
  0xb7   :  { %s180_s18 = scalar_lea.hbm %s285_s3, 16 }
  0xb8   :  { %p181_p5 = scmp.ne.s32.totalorder %s285_s3, %s180_s18  ;;  %p184_p6 = scmp.lt.u32.totalorder %s180_s18, %s285_s3 }
  0xba   :  { %p186_p7 = pnand %p184_p6, %p181_p5 }
  0xbc   :  { %189 = shalt.err (!%p186_p7)
}
  0xbd   :  { %152 = dma.vmem_to_hbm [thread:$0]  %s150_s1, 16, %s285_s3, [#allocation3]  }
  0xbe   :  { %190 = dma.done.wait [#allocation3], 16  }
  0xbf   :  { %191 = vsyncadd [#allocation3], 4294967280 }
  0xc0   :  { %156 = vsyncpa [#allocation3], 1 }

</bundles_post_ra>
